<compile_context>
chip_gen: v6e
topology: v6e:2x2x1
jax: 0.10.0
libtpu: 0.0.40
codegen_flags: <defaults>
</compile_context>

<pallas_src>
import functools
import math

import jax
import jax.numpy as jnp
from jax.experimental import pallas as pl
from jax.experimental.pallas import tpu as pltpu

LANE = 128
SUBLANE = 8


def _round_up(x, m):
    return (x + m - 1) // m * m


def _row_granularity(dtype):
    """Sublane packing: f32 -> 8 rows/vreg, bf16 -> 16 rows/vreg."""
    return SUBLANE * max(1, 4 // jnp.dtype(dtype).itemsize)


def _tpu_vmem_capacity_bytes():
    """Physical VMEM per TensorCore; conservative (v7x: 64 MiB) if unknown."""
    try:
        info = pltpu.get_tpu_info()
        cap = getattr(info, "vmem_capacity_bytes", None)
        if cap:
            return int(cap)
    except Exception:
        pass
    return 64 * 1024 * 1024


_VMEM_CAP = _tpu_vmem_capacity_bytes()
# Budget for weights + activation tiles on the fused path (headroom left for
# compiler scratch / semaphores):   ~46 MiB on v7x, ~92 MiB on v5e/v6e.
_FUSED_VMEM_BUDGET_BYTES = int(_VMEM_CAP * 0.72)
# Scoped VMEM limit handed to Mosaic:  ~54 MiB on v7x, ~108 MiB on v5e/v6e.
_FUSED_VMEM_LIMIT_BYTES = int(_VMEM_CAP * 0.85)


def _fused_act_bytes(tm, k_pad, n_last_pad, max_n_pad):
    """Per-grid-step activation VMEM estimate for the fused kernel."""
    x_bytes = 2 * tm * k_pad * 2        # bf16 x row-tile, double-buffered
    o_bytes = 2 * tm * n_last_pad * 4   # f32 output tile, double-buffered
    h_bytes = 2 * tm * max_n_pad * 4    # f32 intermediates (compiler scratch)
    return x_bytes + o_bytes + h_bytes


# ----------------------------------------------------------------------------
# Fused whole-MLP kernel: one grid step = one tile of rows through every layer.
# Weights/biases stay VMEM-resident (constant index_map); intermediate
# activations never touch HBM.
# ----------------------------------------------------------------------------
def _fused_mlp_kernel(x_ref, *refs, num_layers):
    # refs = (w0, b0, w1, b1, ..., w_{L-1}, b_{L-1}, o_ref)
    o_ref = refs[-1]
    h = x_ref[...]                                   # (tm, K0_pad), bf16
    for i in range(num_layers):                      # static unroll over layers
        w = refs[2 * i][...]                         # (Kpad_i, Npad_i), bf16
        b = refs[2 * i + 1][...]                     # (1, Npad_i), f32
        y = jnp.dot(h.astype(w.dtype), w,            # bf16 MXU, f32 accumulate
                    preferred_element_type=jnp.float32)
        y = y + b                                    # bias broadcast over rows
        if i < num_layers - 1:
            y = jnp.maximum(y, 0.0)                  # ReLU between layers only
        h = y
    o_ref[...] = h.astype(o_ref.dtype)


def mlp_fused(x2d, weights, biases, out_dim, *, tile_m=256,
              weight_bytes=None, compute_dtype=jnp.bfloat16):
    """Run the whole MLP in a single pallas_call.

    x2d:      [M, K0] float32 (unpadded features).
    weights:  list of lane-padded [Kpad_i, Npad_i] arrays (compute dtype).
    biases:   list of lane-padded [1, Npad_i] float32 arrays.
    out_dim:  true (unpadded) output feature count.
    """
    M, K = x2d.shape
    K_pad = weights[0].shape[0]
    N_pad = weights[-1].shape[1]
    max_n_pad = max(w.shape[1] for w in weights)
    num_layers = len(weights)
    if weight_bytes is None:
        weight_bytes = (sum(w.size * w.dtype.itemsize for w in weights)
                        + sum(b.size * b.dtype.itemsize for b in biases))

    gran = _row_granularity(compute_dtype)

    # Largest row tile (<= tile_m) whose activation tiles fit next to the
    # resident weights within the generation-dependent budget.
    tm_cap = max(tile_m, gran)
    while (tm_cap > gran and
           weight_bytes + _fused_act_bytes(tm_cap, K_pad, N_pad, max_n_pad)
           > _FUSED_VMEM_BUDGET_BYTES):
        tm_cap //= 2
    tm_cap = max(_round_up(tm_cap, gran), gran)

    if M <= tm_cap:
        # Use at least two grid steps when M allows so the "parallel" row axis
        # can shard across the two TensorCores on v7x.
        if M >= 2 * gran:
            tm = _round_up((M + 1) // 2, gran)
            M_pad = 2 * tm
        else:
            tm = _round_up(max(M, gran), gran)
            M_pad = tm
    else:
        tm = tm_cap
        M_pad = _round_up(M, tm)

    # Pre-cast x to bf16 in the wrapper: halves the per-step x DMA bytes and
    # removes the layer-0 VPU cast from every grid step.  Zero-padding of
    # rows / feature columns is exactly neutral and sliced off at the end.
    x2d = x2d.astype(compute_dtype)
    if (M_pad != M) or (K_pad != K):
        x2d = jnp.pad(x2d, ((0, M_pad - M), (0, K_pad - K)))

    kernel = functools.partial(_fused_mlp_kernel, num_layers=num_layers)
    operands = [x2d]
    for w, b in zip(weights, biases):
        operands.append(w)
        operands.append(b)

    def build(single_buffer_resident):
        in_specs = [pl.BlockSpec((tm, K_pad), lambda i: (i, 0))]  # row tile of x
        for w, b in zip(weights, biases):
            if single_buffer_resident:
                # Constant index_map => no re-DMA per step; a single buffer is
                # enough, halving the weights' VMEM footprint (key on v7x).
                in_specs.append(pl.BlockSpec(w.shape, lambda i: (0, 0),
                                             pipeline_mode=pl.Buffered(1)))
                in_specs.append(pl.BlockSpec(b.shape, lambda i: (0, 0),
                                             pipeline_mode=pl.Buffered(1)))
            else:
                in_specs.append(pl.BlockSpec(w.shape, lambda i: (0, 0)))
                in_specs.append(pl.BlockSpec(b.shape, lambda i: (0, 0)))
        return pl.pallas_call(
            kernel,
            out_shape=jax.ShapeDtypeStruct((M_pad, N_pad), jnp.float32),
            grid_spec=pltpu.PrefetchScalarGridSpec(
                num_scalar_prefetch=0,
                grid=(M_pad // tm,),
                in_specs=in_specs,
                out_specs=pl.BlockSpec((tm, N_pad), lambda i: (i, 0)),
            ),
            compiler_params=pltpu.CompilerParams(
                dimension_semantics=("parallel",),      # shard rows across TCs
                vmem_limit_bytes=_FUSED_VMEM_LIMIT_BYTES,
            ),
        )

    try:
        out = build(single_buffer_resident=True)(*operands)
    except Exception:
        # Older Pallas without single-buffer pipeline_mode support: fall back
        # to default double-buffered resident specs (still no per-step re-DMA).
        out = build(single_buffer_resident=False)(*operands)

    return out[:M, :out_dim]


# ----------------------------------------------------------------------------
# General tiled linear (fallback when weights can't stay VMEM-resident).
# ----------------------------------------------------------------------------
def _tiled_linear_kernel(x_ref, w_ref, b_ref, o_ref, acc_ref, *, apply_relu):
    k = pl.program_id(2)

    @pl.when(k == 0)
    def _():
        acc_ref[...] = jnp.zeros_like(acc_ref)

    acc_ref[...] += jnp.dot(x_ref[...], w_ref[...],
                            preferred_element_type=jnp.float32)

    @pl.when(k == pl.num_programs(2) - 1)
    def _():
        y = acc_ref[...] + b_ref[...]      # bias applied once, in the epilogue
        if apply_relu:
            y = jnp.maximum(y, 0.0)
        o_ref[...] = y.astype(o_ref.dtype)


def pallas_linear_tiled(x, w, b, *, apply_relu, out_dtype=jnp.float32,
                        tile_m=1024, tile_n=512, tile_k=1024):
    """y = x @ w + b (optional ReLU) with full M/N/K tiling.

    x: [M, K], w: [K, N] (compute dtype, e.g. bf16), b: [N] float32.
    Returns [M, N] in `out_dtype` (bf16 for chained intermediate layers).
    Large M tile first: weight HBM traffic = W_bytes * M_pad/tm.
    """
    M, K = x.shape
    Kw, N = w.shape
    assert K == Kw

    gran = _row_granularity(w.dtype)
    tm = min(tile_m, _round_up(M, gran))
    tn = min(tile_n, _round_up(N, LANE))
    tk = min(tile_k, _round_up(K, LANE))

    M_pad = _round_up(M, tm)
    N_pad = _round_up(N, tn)
    K_pad = _round_up(K, tk)

    xc = x.astype(w.dtype)          # bf16 MXU inputs (no-op if already bf16)
    if (M_pad, K_pad) != (M, K):
        xc = jnp.pad(xc, ((0, M_pad - M), (0, K_pad - K)))
    if (K_pad, N_pad) != (K, N):
        w = jnp.pad(w, ((0, K_pad - K), (0, N_pad - N)))
    if N_pad != N:
        b = jnp.pad(b, (0, N_pad - N))
    b2 = b.reshape(1, N_pad).astype(jnp.float32)

    kernel = functools.partial(_tiled_linear_kernel, apply_relu=apply_relu)
    out = pl.pallas_call(
        kernel,
        out_shape=jax.ShapeDtypeStruct((M_pad, N_pad), out_dtype),
        grid_spec=pltpu.PrefetchScalarGridSpec(
            num_scalar_prefetch=0,
            grid=(M_pad // tm, N_pad // tn, K_pad // tk),
            in_specs=[
                pl.BlockSpec((tm, tk), lambda i, j, k: (i, k)),
                pl.BlockSpec((tk, tn), lambda i, j, k: (k, j)),
                pl.BlockSpec((1, tn), lambda i, j, k: (0, j)),
            ],
            out_specs=pl.BlockSpec((tm, tn), lambda i, j, k: (i, j)),
            scratch_shapes=[pltpu.VMEM((tm, tn), jnp.float32)],
        ),
        compiler_params=pltpu.CompilerParams(
            dimension_semantics=("parallel", "parallel", "arbitrary"),
            vmem_limit_bytes=min(_FUSED_VMEM_LIMIT_BYTES, 48 * 1024 * 1024),
        ),
    )(xc, w, b2)

    return out[:M, :N]


# ----------------------------------------------------------------------------
# Module wrapper (mirrors the PyTorch MLP forward pass).
# ----------------------------------------------------------------------------
class MLPPallas:
    """JAX/Pallas equivalent of the PyTorch MLP module."""

    def __init__(self, input_dim, hidden_dim, output_dim, num_layers, key,
                 compute_dtype=jnp.bfloat16):
        self.num_layers = num_layers
        self.output_dim = output_dim
        self.compute_dtype = compute_dtype

        h = [hidden_dim] * (num_layers - 1)
        dims = list(zip([input_dim] + h, h + [output_dim]))

        # Raw f32 params, mimicking nn.Linear default init U(-1/sqrt(in), ..).
        self.params = []
        for n_in, n_out in dims:
            key, kw, kb = jax.random.split(key, 3)
            bound = 1.0 / math.sqrt(n_in)
            w = jax.random.uniform(kw, (n_in, n_out), jnp.float32, -bound, bound)
            b = jax.random.uniform(kb, (n_out,), jnp.float32, -bound, bound)
            self.params.append((w, b))

        # Lane-dense copies for the fused kernel: every feature dim padded to a
        # multiple of 128 (zero padding is exactly neutral), weights in bf16.
        self.padded_weights = []
        self.padded_biases = []
        weight_bytes = 0
        for (n_in, n_out), (w, b) in zip(dims, self.params):
            in_p = _round_up(n_in, LANE)
            out_p = _round_up(n_out, LANE)
            wp = jnp.zeros((in_p, out_p), compute_dtype).at[:n_in, :n_out].set(
                w.astype(compute_dtype))
            bp = jnp.zeros((1, out_p), jnp.float32).at[0, :n_out].set(b)
            self.padded_weights.append(wp)
            self.padded_biases.append(bp)
            weight_bytes += wp.size * wp.dtype.itemsize + bp.size * 4
        self.weight_bytes = weight_bytes

        # Fused only if weights plus (minimum-size) activation tiles fit the
        # generation-dependent VMEM budget; else chain the bf16 tiled fallback.
        k_pad = self.padded_weights[0].shape[0]
        n_last = self.padded_weights[-1].shape[1]
        max_n = max(w.shape[1] for w in self.padded_weights)
        min_tm = _row_granularity(compute_dtype)
        self.use_fused = (weight_bytes
                          + _fused_act_bytes(min_tm, k_pad, n_last, max_n)
                          <= _FUSED_VMEM_BUDGET_BYTES)

    def __call__(self, x):
        lead = x.shape[:-1]
        xf = x.reshape(-1, x.shape[-1])
        if self.use_fused:
            out = mlp_fused(xf, self.padded_weights, self.padded_biases,
                            self.output_dim, weight_bytes=self.weight_bytes,
                            compute_dtype=self.compute_dtype)
        else:
            # TODO(synk): for very large weights (esp. v7x's 64 MiB VMEM),
            # stream each layer's W K/N-tiled inside ONE kernel
            # (pltpu.emit_pipeline / manual double-buffer) while keeping the
            # activation tile in VMEM, instead of bouncing activations through
            # HBM between per-layer calls.
            out = xf.astype(self.compute_dtype)     # bf16-chained activations
            for i, (w, b) in enumerate(self.params):
                last = (i == self.num_layers - 1)
                out = pallas_linear_tiled(
                    out, w.astype(self.compute_dtype), b,
                    apply_relu=not last,
                    out_dtype=jnp.float32 if last else self.compute_dtype)
        return out.reshape(*lead, out.shape[-1])


def _reference(mlp, x, compute_dtype=jnp.float32):
    """Pure-JAX reference; compute_dtype mimics the kernel's matmul-input cast."""
    lead = x.shape[:-1]
    xf = x.reshape(-1, x.shape[-1])
    for i, (w, b) in enumerate(mlp.params):
        xf = jnp.dot(xf.astype(compute_dtype).astype(jnp.float32),
                     w.astype(compute_dtype).astype(jnp.float32)) + b
        if i < mlp.num_layers - 1:
            xf = jnp.maximum(xf, 0.0)
    return xf.reshape(*lead, xf.shape[-1])


if __name__ == "__main__":
    key = jax.random.PRNGKey(0)
    k_param, k_x, k_lin = jax.random.split(key, 3)

    batch, seq = 2, 8
    input_dim, hidden_dim, output_dim, num_layers = 32, 32, 16, 3

    mlp = MLPPallas(input_dim, hidden_dim, output_dim, num_layers, k_param)
    x = jax.random.normal(k_x, (batch, seq, input_dim), jnp.float32)

    out = jax.block_until_ready(mlp(x))
    assert out.shape == (batch, seq, output_dim)

    # Check against a reference that mimics the kernel's bf16 matmul inputs.
    ref_bf16 = _reference(mlp, x, compute_dtype=jnp.bfloat16)
    assert jnp.allclose(out, ref_bf16, atol=2e-3, rtol=2e-3), \
        "fused mismatch vs bf16-input reference"

    # Sanity check against the pure-f32 reference (bf16 matmul tolerance).
    ref_f32 = _reference(mlp, x, compute_dtype=jnp.float32)
    assert jnp.allclose(out, ref_f32, atol=5e-2, rtol=5e-2), \
        "fused mismatch vs f32 reference"

    # Exercise the per-layer tiled fallback path (bf16-chained activations).
    mlp.use_fused = False
    out_fb = jax.block_until_ready(mlp(x))
    mlp.use_fused = True
    assert out_fb.shape == (batch, seq, output_dim)
    assert jnp.allclose(out_fb, ref_f32, atol=5e-2, rtol=5e-2), \
        "fallback mismatch vs f32 reference"

    # Also exercise the general tiled linear on a moderate standalone shape.
    km, kw, kb = jax.random.split(k_lin, 3)
    M, K, N = 512, 384, 256
    xl = jax.random.normal(km, (M, K), jnp.float32)
    wl = jax.random.normal(kw, (K, N), jnp.float32) * (1.0 / math.sqrt(K))
    bl = jax.random.normal(kb, (N,), jnp.float32)
    yl = jax.block_until_ready(
        pallas_linear_tiled(xl, wl.astype(jnp.bfloat16), bl, apply_relu=True))
    yl_ref = jnp.maximum(
        xl.astype(jnp.bfloat16).astype(jnp.float32)
        @ wl.astype(jnp.bfloat16).astype(jnp.float32) + bl, 0.0)
    assert yl.shape == (M, N)
    assert jnp.allclose(yl, yl_ref, atol=2e-3, rtol=2e-3), \
        "tiled-linear mismatch vs reference"

    print("KERNEL_OK")
</pallas_src>

<mosaic_0001>
module attributes {stable_mosaic.version = 11 : i64} {
  func.func @_fused_mlp_kernel(%arg0: i32, %arg1: memref<16x128xbf16, #tpu.memory_space<vmem>>, %arg2: memref<128x128xbf16, #tpu.memory_space<vmem>>, %arg3: memref<1x128xf32, #tpu.memory_space<vmem>>, %arg4: memref<128x128xbf16, #tpu.memory_space<vmem>>, %arg5: memref<1x128xf32, #tpu.memory_space<vmem>>, %arg6: memref<128x128xbf16, #tpu.memory_space<vmem>>, %arg7: memref<1x128xf32, #tpu.memory_space<vmem>>, %arg8: memref<16x128xf32, #tpu.memory_space<vmem>>) attributes {dimension_semantics = [#tpu.dimension_semantics<parallel>], iteration_bounds = array<i64: 1>, scalar_prefetch = 0 : i64, scratch_operands = 0 : i64, tpu.core_type = #tpu.core_type<tc>, window_params = [{transform_indices = @transform_0, window_bounds = array<i64: 16, 128>}, {pipeline_mode = #tpu.pipeline_mode<synchronous>, transform_indices = @transform_1, window_bounds = array<i64: 128, 128>}, {pipeline_mode = #tpu.pipeline_mode<synchronous>, transform_indices = @transform_2, window_bounds = array<i64: 1, 128>}, {pipeline_mode = #tpu.pipeline_mode<synchronous>, transform_indices = @transform_3, window_bounds = array<i64: 128, 128>}, {pipeline_mode = #tpu.pipeline_mode<synchronous>, transform_indices = @transform_4, window_bounds = array<i64: 1, 128>}, {pipeline_mode = #tpu.pipeline_mode<synchronous>, transform_indices = @transform_5, window_bounds = array<i64: 128, 128>}, {pipeline_mode = #tpu.pipeline_mode<synchronous>, transform_indices = @transform_6, window_bounds = array<i64: 1, 128>}, {transform_indices = @transform_7, window_bounds = array<i64: 16, 128>}]} {
    %c0 = arith.constant 0 : index
    %c0_0 = arith.constant 0 : index
    %0 = vector.load %arg1[%c0, %c0_0] : memref<16x128xbf16, #tpu.memory_space<vmem>>, vector<16x128xbf16>
    %c0_1 = arith.constant 0 : index
    %c0_2 = arith.constant 0 : index
    %1 = vector.load %arg2[%c0_1, %c0_2] : memref<128x128xbf16, #tpu.memory_space<vmem>>, vector<128x128xbf16>
    %c0_3 = arith.constant 0 : index
    %c0_4 = arith.constant 0 : index
    %2 = vector.load %arg3[%c0_3, %c0_4] : memref<1x128xf32, #tpu.memory_space<vmem>>, vector<1x128xf32>
    %cst = arith.constant dense<0.000000e+00> : vector<16x128xf32>
    %3 = tpu.matmul %0, %1, %cst {dimension_numbers = #tpu.dot_dimension_numbers<[1], [0], [0], [1], [0, 0, 1, 1], [], []>} : vector<16x128xbf16>, vector<128x128xbf16>, vector<16x128xf32> -> vector<16x128xf32>
    %4 = vector.broadcast %2 : vector<1x128xf32> to vector<16x128xf32>
    %5 = arith.addf %3, %4 : vector<16x128xf32>
    %cst_5 = arith.constant 0.000000e+00 : f32
    %6 = vector.broadcast %cst_5 : f32 to vector<16x128xf32>
    %7 = arith.maximumf %5, %6 : vector<16x128xf32>
    %c0_6 = arith.constant 0 : index
    %c0_7 = arith.constant 0 : index
    %8 = vector.load %arg4[%c0_6, %c0_7] : memref<128x128xbf16, #tpu.memory_space<vmem>>, vector<128x128xbf16>
    %c0_8 = arith.constant 0 : index
    %c0_9 = arith.constant 0 : index
    %9 = vector.load %arg5[%c0_8, %c0_9] : memref<1x128xf32, #tpu.memory_space<vmem>>, vector<1x128xf32>
    %10 = arith.truncf %7 : vector<16x128xf32> to vector<16x128xbf16>
    %cst_10 = arith.constant dense<0.000000e+00> : vector<16x128xf32>
    %11 = tpu.matmul %10, %8, %cst_10 {dimension_numbers = #tpu.dot_dimension_numbers<[1], [0], [0], [1], [0, 0, 1, 1], [], []>} : vector<16x128xbf16>, vector<128x128xbf16>, vector<16x128xf32> -> vector<16x128xf32>
    %12 = vector.broadcast %9 : vector<1x128xf32> to vector<16x128xf32>
    %13 = arith.addf %11, %12 : vector<16x128xf32>
    %cst_11 = arith.constant 0.000000e+00 : f32
    %14 = vector.broadcast %cst_11 : f32 to vector<16x128xf32>
    %15 = arith.maximumf %13, %14 : vector<16x128xf32>
    %c0_12 = arith.constant 0 : index
    %c0_13 = arith.constant 0 : index
    %16 = vector.load %arg6[%c0_12, %c0_13] : memref<128x128xbf16, #tpu.memory_space<vmem>>, vector<128x128xbf16>
    %c0_14 = arith.constant 0 : index
    %c0_15 = arith.constant 0 : index
    %17 = vector.load %arg7[%c0_14, %c0_15] : memref<1x128xf32, #tpu.memory_space<vmem>>, vector<1x128xf32>
    %18 = arith.truncf %15 : vector<16x128xf32> to vector<16x128xbf16>
    %cst_16 = arith.constant dense<0.000000e+00> : vector<16x128xf32>
    %19 = tpu.matmul %18, %16, %cst_16 {dimension_numbers = #tpu.dot_dimension_numbers<[1], [0], [0], [1], [0, 0, 1, 1], [], []>} : vector<16x128xbf16>, vector<128x128xbf16>, vector<16x128xf32> -> vector<16x128xf32>
    %20 = vector.broadcast %17 : vector<1x128xf32> to vector<16x128xf32>
    %21 = arith.addf %19, %20 : vector<16x128xf32>
    %c0_17 = arith.constant 0 : index
    %c0_18 = arith.constant 0 : index
    %22 = vector.load %arg8[%c0_17, %c0_18] : memref<16x128xf32, #tpu.memory_space<vmem>>, vector<16x128xf32>
    tpu.vector_store %arg8[%c0_17, %c0_18], %21 {strides = array<i32>} : memref<16x128xf32, #tpu.memory_space<vmem>>, vector<16x128xf32>,
    return
  }
  func.func @transform_0(%arg0: i32) -> (i32, i32) {
    %c0_i32 = arith.constant 0 : i32
    %c0_i32_0 = arith.constant 0 : i32
    return %arg0, %c0_i32 : i32, i32
  }
  func.func @transform_1(%arg0: i32) -> (i32, i32) {
    %c0_i32 = arith.constant 0 : i32
    %c0_i32_0 = arith.constant 0 : i32
    %c0_i32_1 = arith.constant 0 : i32
    return %c0_i32, %c0_i32_0 : i32, i32
  }
  func.func @transform_2(%arg0: i32) -> (i32, i32) {
    %c0_i32 = arith.constant 0 : i32
    %c0_i32_0 = arith.constant 0 : i32
    %c0_i32_1 = arith.constant 0 : i32
    return %c0_i32, %c0_i32_0 : i32, i32
  }
  func.func @transform_3(%arg0: i32) -> (i32, i32) {
    %c0_i32 = arith.constant 0 : i32
    %c0_i32_0 = arith.constant 0 : i32
    %c0_i32_1 = arith.constant 0 : i32
    return %c0_i32, %c0_i32_0 : i32, i32
  }
  func.func @transform_4(%arg0: i32) -> (i32, i32) {
    %c0_i32 = arith.constant 0 : i32
    %c0_i32_0 = arith.constant 0 : i32
    %c0_i32_1 = arith.constant 0 : i32
    return %c0_i32, %c0_i32_0 : i32, i32
  }
  func.func @transform_5(%arg0: i32) -> (i32, i32) {
    %c0_i32 = arith.constant 0 : i32
    %c0_i32_0 = arith.constant 0 : i32
    %c0_i32_1 = arith.constant 0 : i32
    return %c0_i32, %c0_i32_0 : i32, i32
  }
  func.func @transform_6(%arg0: i32) -> (i32, i32) {
    %c0_i32 = arith.constant 0 : i32
    %c0_i32_0 = arith.constant 0 : i32
    %c0_i32_1 = arith.constant 0 : i32
    return %c0_i32, %c0_i32_0 : i32, i32
  }
  func.func @transform_7(%arg0: i32) -> (i32, i32) {
    %c0_i32 = arith.constant 0 : i32
    %c0_i32_0 = arith.constant 0 : i32
    return %arg0, %c0_i32 : i32, i32
  }
}

module attributes {stable_mosaic.version = 11 : i64} {
  func.func @_fused_mlp_kernel(%arg0: i32, %arg1: memref<16x128xbf16, #tpu.memory_space<vmem>>, %arg2: memref<128x128xbf16, #tpu.memory_space<vmem>>, %arg3: memref<1x128xf32, #tpu.memory_space<vmem>>, %arg4: memref<128x128xbf16, #tpu.memory_space<vmem>>, %arg5: memref<1x128xf32, #tpu.memory_space<vmem>>, %arg6: memref<128x128xbf16, #tpu.memory_space<vmem>>, %arg7: memref<1x128xf32, #tpu.memory_space<vmem>>, %arg8: memref<16x128xf32, #tpu.memory_space<vmem>>) attributes {dimension_semantics = [#tpu.dimension_semantics<parallel>], iteration_bounds = array<i64: 1>, scalar_prefetch = 0 : i64, scratch_operands = 0 : i64, tpu.core_type = #tpu.core_type<tc>, window_params = [{transform_indices = @transform_0, window_bounds = array<i64: 16, 128>}, {pipeline_mode = #tpu.pipeline_mode<synchronous>, transform_indices = @transform_1, window_bounds = array<i64: 128, 128>}, {pipeline_mode = #tpu.pipeline_mode<synchronous>, transform_indices = @transform_2, window_bounds = array<i64: 1, 128>}, {pipeline_mode = #tpu.pipeline_mode<synchronous>, transform_indices = @transform_3, window_bounds = array<i64: 128, 128>}, {pipeline_mode = #tpu.pipeline_mode<synchronous>, transform_indices = @transform_4, window_bounds = array<i64: 1, 128>}, {pipeline_mode = #tpu.pipeline_mode<synchronous>, transform_indices = @transform_5, window_bounds = array<i64: 128, 128>}, {pipeline_mode = #tpu.pipeline_mode<synchronous>, transform_indices = @transform_6, window_bounds = array<i64: 1, 128>}, {transform_indices = @transform_7, window_bounds = array<i64: 16, 128>}]} {
    %c0 = arith.constant 0 : index
    %c0_0 = arith.constant 0 : index
    %0 = vector.load %arg1[%c0, %c0_0] : memref<16x128xbf16, #tpu.memory_space<vmem>>, vector<16x128xbf16>
    %c0_1 = arith.constant 0 : index
    %c0_2 = arith.constant 0 : index
    %1 = vector.load %arg2[%c0_1, %c0_2] : memref<128x128xbf16, #tpu.memory_space<vmem>>, vector<128x128xbf16>
    %c0_3 = arith.constant 0 : index
    %c0_4 = arith.constant 0 : index
    %2 = vector.load %arg3[%c0_3, %c0_4] : memref<1x128xf32, #tpu.memory_space<vmem>>, vector<1x128xf32>
    %cst = arith.constant dense<0.000000e+00> : vector<16x128xf32>
    %3 = tpu.matmul %0, %1, %cst {dimension_numbers = #tpu.dot_dimension_numbers<[1], [0], [0], [1], [0, 0, 1, 1], [], []>} : vector<16x128xbf16>, vector<128x128xbf16>, vector<16x128xf32> -> vector<16x128xf32>
    %4 = vector.broadcast %2 : vector<1x128xf32> to vector<16x128xf32>
    %5 = arith.addf %3, %4 : vector<16x128xf32>
    %cst_5 = arith.constant 0.000000e+00 : f32
    %6 = vector.broadcast %cst_5 : f32 to vector<16x128xf32>
    %7 = arith.maximumf %5, %6 : vector<16x128xf32>
    %c0_6 = arith.constant 0 : index
    %c0_7 = arith.constant 0 : index
    %8 = vector.load %arg4[%c0_6, %c0_7] : memref<128x128xbf16, #tpu.memory_space<vmem>>, vector<128x128xbf16>
    %c0_8 = arith.constant 0 : index
    %c0_9 = arith.constant 0 : index
    %9 = vector.load %arg5[%c0_8, %c0_9] : memref<1x128xf32, #tpu.memory_space<vmem>>, vector<1x128xf32>
    %10 = arith.truncf %7 : vector<16x128xf32> to vector<16x128xbf16>
    %cst_10 = arith.constant dense<0.000000e+00> : vector<16x128xf32>
    %11 = tpu.matmul %10, %8, %cst_10 {dimension_numbers = #tpu.dot_dimension_numbers<[1], [0], [0], [1], [0, 0, 1, 1], [], []>} : vector<16x128xbf16>, vector<128x128xbf16>, vector<16x128xf32> -> vector<16x128xf32>
    %12 = vector.broadcast %9 : vector<1x128xf32> to vector<16x128xf32>
    %13 = arith.addf %11, %12 : vector<16x128xf32>
    %cst_11 = arith.constant 0.000000e+00 : f32
    %14 = vector.broadcast %cst_11 : f32 to vector<16x128xf32>
    %15 = arith.maximumf %13, %14 : vector<16x128xf32>
    %c0_12 = arith.constant 0 : index
    %c0_13 = arith.constant 0 : index
    %16 = vector.load %arg6[%c0_12, %c0_13] : memref<128x128xbf16, #tpu.memory_space<vmem>>, vector<128x128xbf16>
    %c0_14 = arith.constant 0 : index
    %c0_15 = arith.constant 0 : index
    %17 = vector.load %arg7[%c0_14, %c0_15] : memref<1x128xf32, #tpu.memory_space<vmem>>, vector<1x128xf32>
    %18 = arith.truncf %15 : vector<16x128xf32> to vector<16x128xbf16>
    %cst_16 = arith.constant dense<0.000000e+00> : vector<16x128xf32>
    %19 = tpu.matmul %18, %16, %cst_16 {dimension_numbers = #tpu.dot_dimension_numbers<[1], [0], [0], [1], [0, 0, 1, 1], [], []>} : vector<16x128xbf16>, vector<128x128xbf16>, vector<16x128xf32> -> vector<16x128xf32>
    %20 = vector.broadcast %17 : vector<1x128xf32> to vector<16x128xf32>
    %21 = arith.addf %19, %20 : vector<16x128xf32>
    %c0_17 = arith.constant 0 : index
    %c0_18 = arith.constant 0 : index
    %22 = vector.load %arg8[%c0_17, %c0_18] : memref<16x128xf32, #tpu.memory_space<vmem>>, vector<16x128xf32>
    tpu.vector_store %arg8[%c0_17, %c0_18], %21 {strides = array<i32>} : memref<16x128xf32, #tpu.memory_space<vmem>>, vector<16x128xf32>,
    return
  }
  func.func @transform_0(%arg0: i32) -> (i32, i32) {
    %c0_i32 = arith.constant 0 : i32
    %c0_i32_0 = arith.constant 0 : i32
    return %arg0, %c0_i32 : i32, i32
  }
  func.func @transform_1(%arg0: i32) -> (i32, i32) {
    %c0_i32 = arith.constant 0 : i32
    %c0_i32_0 = arith.constant 0 : i32
    %c0_i32_1 = arith.constant 0 : i32
    return %c0_i32, %c0_i32_0 : i32, i32
  }
  func.func @transform_2(%arg0: i32) -> (i32, i32) {
    %c0_i32 = arith.constant 0 : i32
    %c0_i32_0 = arith.constant 0 : i32
    %c0_i32_1 = arith.constant 0 : i32
    return %c0_i32, %c0_i32_0 : i32, i32
  }
  func.func @transform_3(%arg0: i32) -> (i32, i32) {
    %c0_i32 = arith.constant 0 : i32
    %c0_i32_0 = arith.constant 0 : i32
    %c0_i32_1 = arith.constant 0 : i32
    return %c0_i32, %c0_i32_0 : i32, i32
  }
  func.func @transform_4(%arg0: i32) -> (i32, i32) {
    %c0_i32 = arith.constant 0 : i32
    %c0_i32_0 = arith.constant 0 : i32
    %c0_i32_1 = arith.constant 0 : i32
    return %c0_i32, %c0_i32_0 : i32, i32
  }
  func.func @transform_5(%arg0: i32) -> (i32, i32) {
    %c0_i32 = arith.constant 0 : i32
    %c0_i32_0 = arith.constant 0 : i32
    %c0_i32_1 = arith.constant 0 : i32
    return %c0_i32, %c0_i32_0 : i32, i32
  }
  func.func @transform_6(%arg0: i32) -> (i32, i32) {
    %c0_i32 = arith.constant 0 : i32
    %c0_i32_0 = arith.constant 0 : i32
    %c0_i32_1 = arith.constant 0 : i32
    return %c0_i32, %c0_i32_0 : i32, i32
  }
  func.func @transform_7(%arg0: i32) -> (i32, i32) {
    %c0_i32 = arith.constant 0 : i32
    %c0_i32_0 = arith.constant 0 : i32
    return %arg0, %c0_i32 : i32, i32
  }
}

</mosaic_0001>

<bundles_post_ra>
// kernel: tpu_custom_call.1
= control target key start
LH: loop header
LB: loop body
LE: loop exit
PB: predicated region body
PF: predicated region fallthrough
CT: control target
= control target key end

     0   :  { %12 = vsyncpa [#allocation3], 0  ;;  %s830_s0 = inlined_call_operand.hbm [shape: bf16[16,128], index: 0, kind: input, shape index: {}]   ;;  %s831_s1 = inlined_call_operand.hbm [shape: bf16[128,128], index: 1, kind: input, shape index: {}]   ;;  %s832_s2 = inlined_call_operand.vmem [shape: f32[1,128], index: 2, kind: input, shape index: {}]   ;;  %s833_s3 = inlined_call_operand.hbm [shape: bf16[128,128], index: 3, kind: input, shape index: {}]   ;;  %s834_s4 = inlined_call_operand.vmem [shape: f32[1,128], index: 4, kind: input, shape index: {}]   ;;  %s835_s5 = inlined_call_operand.hbm [shape: bf16[128,128], index: 5, kind: input, shape index: {}]   ;;  %s836_s6 = inlined_call_operand.vmem [shape: f32[1,128], index: 6, kind: input, shape index: {}]   ;;  %s837_s7 = inlined_call_operand.hbm [shape: f32[16,128], index: 7, kind: output, shape index: {}]  }
   0x1   :  { %13 = vsyncpa [#allocation6], 0 }
   0x2   :  { %14 = vsyncpa [#allocation9], 0 }
   0x3   :  { %15 = vsyncpa [#allocation4], 0  ;;  %s713_s24 = smov [#allocation5]   ;;  %s714_s26 = smov [#allocation2]  }
   0x4   :  { %s33_s25 = sshll.u32 %s713_s24, 4  ;;  %s21_s27 = sshll.u32 %s714_s26, 4  ;;  %s34_s25 = int_to_ptr.vmem [resolvable:$true] %s33_s25  ;;  %s22_s27 = int_to_ptr.vmem [resolvable:$true] %s21_s27 }
   0x5   :  { %s613_s28 = scalar_lea.vmem %s34_s25, 1024  ;;  %p618_p1 = scmp.lt.s32.totalorder %s34_s25, %s34_s25 }
   0x6   :  { %p614_p0 = scmp.ne.s32.totalorder %s34_s25, %s613_s28  ;;  %p619_p2 = scmp.lt.s32.totalorder %s613_s28, %s613_s28 }
   0x8   :  { %p620_p3 = por %p619_p2, %p618_p1 }
   0xa   :  { %p621_p4 = pnand %p620_p3, %p614_p0 }
   0xc   :  { %624 = shalt.err (!%p621_p4)
}
   0xd   :  { %s715_s29 = smov 64   ;;  %s716_s30 = smov 4  }
   0xe   :  { %39 = dma.hbm_to_vmem [thread:$0]  %s831_s1, 1024, %s34_s25, [#allocation6], %s715_s29, %s715_s29, %s716_s30  }
   0xf   :  { %s633_s10 = scalar_lea.vmem %s22_s27, 128  ;;  %p638_p6 = scmp.lt.s32.totalorder %s22_s27, %s22_s27 }
  0x10   :  { %p634_p5 = scmp.ne.s32.totalorder %s22_s27, %s633_s10  ;;  %p639_p7 = scmp.lt.s32.totalorder %s633_s10, %s633_s10 }
  0x12   :  { %p640_p8 = por %p639_p7, %p638_p6 }
  0x14   :  { %p641_p9 = pnand %p640_p8, %p634_p5 }
  0x16   :  { %644 = shalt.err (!%p641_p9)
}
  0x17   :  { %27 = dma.hbm_to_vmem [thread:$0]  %s830_s0, 128, %s22_s27, [#allocation3], %s715_s29, %s715_s29, %s716_s30  }
  0x18   :  { %s717_s13 = smov [#allocation7]   ;;  %s718_s15 = smov [#allocation8]  }
  0x19   :  { %s47_s14 = sshll.u32 %s717_s13, 4  ;;  %s61_s16 = sshll.u32 %s718_s15, 4  ;;  %s48_s14 = int_to_ptr.vmem [resolvable:$true] %s47_s14  ;;  %s62_s16 = int_to_ptr.vmem [resolvable:$true] %s61_s16 }
  0x1a   :  { %s653_s1 = scalar_lea.vmem %s48_s14, 1024  ;;  %p658_p11 = scmp.lt.s32.totalorder %s48_s14, %s48_s14 }
  0x1b   :  { %p654_p10 = scmp.ne.s32.totalorder %s48_s14, %s653_s1  ;;  %p659_p12 = scmp.lt.s32.totalorder %s653_s1, %s653_s1 }
  0x1d   :  { %p660_p13 = por %p659_p12, %p658_p11 }
  0x1f   :  { %p661_p0 = pnand %p660_p13, %p654_p10 }
  0x21   :  { %664 = shalt.err (!%p661_p0)
}
  0x22   :  { %53 = dma.hbm_to_vmem [thread:$0]  %s833_s3, 1024, %s48_s14, [#allocation6], %s715_s29, %s715_s29, %s716_s30  }
  0x23   :  { %s673_s0 = scalar_lea.vmem %s62_s16, 1024  ;;  %p678_p2 = scmp.lt.s32.totalorder %s62_s16, %s62_s16 }
  0x24   :  { %p674_p1 = scmp.ne.s32.totalorder %s62_s16, %s673_s0  ;;  %p679_p3 = scmp.lt.s32.totalorder %s673_s0, %s673_s0 }
  0x26   :  { %p680_p4 = por %p679_p3, %p678_p2 }
  0x28   :  { %p681_p5 = pnand %p680_p4, %p674_p1 }
  0x2a   :  { %684 = shalt.err (!%p681_p5)
}
  0x2b   :  { %67 = dma.hbm_to_vmem [thread:$0]  %s835_s5, 1024, %s62_s16, [#allocation9], %s715_s29, %s715_s29, %s716_s30  }
  0x2c   :  { %705 = dma.done.wait [#allocation3], 128  }
  0x2d   :  { %706 = vsyncadd [#allocation3], 4294967168 }
  0x2e   :  { %707 = dma.done.wait [#allocation6], 2048  }
  0x2f   :  { %708 = vsyncadd [#allocation6], 4294965248 }
  0x30   :  { %709 = dma.done.wait [#allocation9], 1024  }
  0x31   :  { %710 = vsyncadd [#allocation9], 4294966272  ;;  %v719_v0 = vmov 0.0   ;;  %vm720_vm0 = vmmov 0   ;;  %v580_v1 = vld [vmem:[#allocation5 + $0x38] sm:$0xff]   ;;  %v581_v2 = vld [vmem:[#allocation5 + $0x30] sm:$0xff]  }
  0x32   :  { %509 = vmatprep.subr.bf16.mxu0 %v719_v0  ;;  %525 = vmatprep.mubr.msk.bf16.mxu0 %vm720_vm0, %v719_v0  ;;  %v582_v3 = vld [vmem:[#allocation5 + $0x28] sm:$0xff]   ;;  %v589_v4 = vld [vmem:[#allocation7 + $0x38] sm:$0xff]   ;;  %v583_v5 = vld [vmem:[#allocation5 + $0x20] sm:$0xff]   ;;  %s721_s24 = smov [#allocation10]  }
  0x33   :  { %529 = vmatprep.subr.bf16.mxu1 %v719_v0  ;;  %545 = vmatprep.mubr.msk.bf16.mxu1 %vm720_vm0, %v719_v0  ;;  %v590_v6 = vld [vmem:[#allocation7 + $0x30] sm:$0xff]   ;;  %v584_v7 = vld [vmem:[#allocation5 + $0x18] sm:$0xff]   ;;  %v591_v8 = vld [vmem:[#allocation7 + $0x28] sm:$0xff]   ;;  %s440_s25 = sshll.u32 %s721_s24, 4  ;;  %s441_s25 = int_to_ptr.vmem [resolvable:$true] %s440_s25 }
  0x34   :  { %510 = vmatpush3.bf16.msra.mxu0 %v580_v1  ;;  %530 = vmatpush3.bf16.msra.mxu1 %v589_v4  ;;  %v585_v9 = vld [vmem:[#allocation5 + $0x10] sm:$0xff]   ;;  %v592_v10 = vld [vmem:[#allocation7 + $0x20] sm:$0xff]   ;;  %v586_v11 = vld [vmem:[#allocation5 + $0x8] sm:$0xff]   ;;  %p690_p7 = scmp.lt.s32.totalorder %s441_s25, %s441_s25 }
  0x35   :  { %511 = vmatprep.subr.bf16.mxu0 %v719_v0  ;;  %531 = vmatprep.subr.bf16.mxu1 %v719_v0  ;;  %v593_v12 = vld [vmem:[#allocation7 + $0x18] sm:$0xff]   ;;  %v587_v13 = vld [vmem:[#allocation5] sm:$0xff]   ;;  %v594_v15 = vld [vmem:[#allocation7 + $0x10] sm:$0xff]  }
  0x36   :  { %v588_v14 = vld [vmem:[#allocation2] sm:$0xff]   ;;  %v595_v16 = vld [vmem:[#allocation7 + $0x8] sm:$0xff]   ;;  %v596_v17 = vld [vmem:[#allocation7] sm:$0xff]  }
  0x37   :  { %v597_v18 = vld [vmem:[#allocation8 + $0x38] sm:$0xff]   ;;  %v598_v19 = vld [vmem:[#allocation8 + $0x30] sm:$0xff]   ;;  %v599_v20 = vld [vmem:[#allocation8 + $0x28] sm:$0xff]  }
  0x38   :  { %512 = vmatpush3.bf16.msra.mxu0 %v581_v2  ;;  %532 = vmatpush3.bf16.msra.mxu1 %v590_v6  ;;  %v600_v21 = vld [vmem:[#allocation8 + $0x20] sm:$0xff]   ;;  %v601_v22 = vld [vmem:[#allocation8 + $0x18] sm:$0xff]   ;;  %v602_v33 = vld [vmem:[#allocation8 + $0x10] sm:$0xff]  }
  0x39   :  { %513 = vmatprep.subr.bf16.mxu0 %v719_v0  ;;  %533 = vmatprep.subr.bf16.mxu1 %v719_v0  ;;  %v454_v23 = vld [vmem:[%s832_s2] ss:$0 sm:$0xff]  ;;  %v603_v34 = vld [vmem:[#allocation8 + $0x8] sm:$0xff]   ;;  %v604_v35 = vld [vmem:[#allocation8] sm:$0xff]  }
  0x3a   :  { %v464_v36 = vld [vmem:[%s834_s4] ss:$0 sm:$0xff]  ;;  %s685_s4 = scalar_lea.vmem %s441_s25, 256 }
  0x3b   :  { %v473_v46 = vld [vmem:[%s836_s6] ss:$0 sm:$0xff]  ;;  %p686_p6 = scmp.ne.s32.totalorder %s441_s25, %s685_s4  ;;  %p691_p8 = scmp.lt.s32.totalorder %s685_s4, %s685_s4 }
  0x3c   :  { %514 = vmatpush3.bf16.msra.mxu0 %v582_v3  ;;  %534 = vmatpush3.bf16.msra.mxu1 %v591_v8 }
  0x3d   :  { %515 = vmatprep.subr.bf16.mxu0 %v719_v0  ;;  %535 = vmatprep.subr.bf16.mxu1 %v719_v0  ;;  %p692_p9 = por %p691_p8, %p690_p7 }
  0x3f   :  { %p693_p10 = pnand %p692_p9, %p686_p6 }
  0x40   :  { %516 = vmatpush3.bf16.msra.mxu0 %v583_v5  ;;  %536 = vmatpush3.bf16.msra.mxu1 %v592_v10 }
  0x41   :  { %517 = vmatprep.subr.bf16.mxu0 %v719_v0  ;;  %537 = vmatprep.subr.bf16.mxu1 %v719_v0 }
  0x44   :  { %518 = vmatpush3.bf16.msra.mxu0 %v584_v7  ;;  %538 = vmatpush3.bf16.msra.mxu1 %v593_v12 }
  0x45   :  { %519 = vmatprep.subr.bf16.mxu0 %v719_v0  ;;  %539 = vmatprep.subr.bf16.mxu1 %v719_v0 }
  0x48   :  { %520 = vmatpush3.bf16.msra.mxu0 %v585_v9  ;;  %540 = vmatpush3.bf16.msra.mxu1 %v594_v15 }
  0x49   :  { %521 = vmatprep.subr.bf16.mxu0 %v719_v0  ;;  %541 = vmatprep.subr.bf16.mxu1 %v719_v0 }
  0x4c   :  { %522 = vmatpush3.bf16.msra.mxu0 %v586_v11  ;;  %542 = vmatpush3.bf16.msra.mxu1 %v595_v16 }
  0x4d   :  { %523 = vmatprep.subr.bf16.mxu0 %v719_v0  ;;  %543 = vmatprep.subr.bf16.mxu1 %v719_v0 }
  0x50   :  { %524 = vmatpush3.bf16.msra.mxu0 %v587_v13  ;;  %544 = vmatpush3.bf16.msra.mxu1 %v596_v17 }
  0x51   :  { %549 = vmatprep.subr.bf16.mxu0 %v719_v0 }
  0x53   :  { %526 = vmatmul.mubr.bf16.vlgmr.msra.gmra.mxu0 %v588_v14 }
  0x54   :  { %565 = vmatprep.mubr.msk.bf16.mxu0 %vm720_vm0, %v719_v0  ;;  %550 = vmatpush3.bf16.msra.mxu0 %v597_v18 }
  0x55   :  { %551 = vmatprep.subr.bf16.mxu0 %v719_v0 }
  0x58   :  { %552 = vmatpush3.bf16.msra.mxu0 %v598_v19 }
  0x59   :  { %553 = vmatprep.subr.bf16.mxu0 %v719_v0 }
  0x5c   :  { %554 = vmatpush3.bf16.msra.mxu0 %v599_v20 }
  0x5d   :  { %555 = vmatprep.subr.bf16.mxu0 %v719_v0 }
  0x60   :  { %556 = vmatpush3.bf16.msra.mxu0 %v600_v21 }
  0x61   :  { %557 = vmatprep.subr.bf16.mxu0 %v719_v0 }
  0x64   :  { %558 = vmatpush3.bf16.msra.mxu0 %v601_v22 }
  0x65   :  { %559 = vmatprep.subr.bf16.mxu0 %v719_v0 }
  0x68   :  { %560 = vmatpush3.bf16.msra.mxu0 %v602_v33 }
  0x69   :  { %561 = vmatprep.subr.bf16.mxu0 %v719_v0 }
  0x6c   :  { %562 = vmatpush3.bf16.msra.mxu0 %v603_v34 }
  0x6d   :  { %563 = vmatprep.subr.bf16.mxu0 %v719_v0 }
  0x70   :  { %564 = vmatpush3.bf16.msra.mxu0 %v604_v35 }
 0x113   :  { %v196_v24 = vpop.f32.mrf.mxu0 }
 0x114   :  { %v197_v26 = vadd.f32 %v454_v23, %v196_v24 }
 0x115   :  { %v527_v25 = vpop.f32.mrf.mxu0 }
 0x116   :  { %v203_v30 = vmax.f32 %v197_v26, 0.0 }
 0x117   :  { %v199_v27 = vpop.f32.mrf.mxu0 }
 0x118   :  { %v200_v28 = vadd.f32 %v454_v23, %v199_v27 }
 0x119   :  { %v528_v29 = vpop.f32.mrf.mxu0 }
 0x11a   :  { %v204_v31 = vmax.f32 %v200_v28, 0.0 }
 0x11c   :  { %v222_v32 = vpack.c.bf16 %v204_v31, %v203_v30 }
 0x11e   :  { %546 = vmatmul.mubr.bf16.vlgmr.msra.gmra.mxu1 %v222_v32 }
 0x1de   :  { %v311_v37 = vpop.f32.mrf.mxu1 }
 0x1df   :  { %v312_v39 = vadd.f32 %v464_v36, %v311_v37 }
 0x1e0   :  { %v547_v38 = vpop.f32.mrf.mxu1 }
 0x1e1   :  { %v318_v43 = vmax.f32 %v312_v39, 0.0 }
 0x1e2   :  { %v314_v40 = vpop.f32.mrf.mxu1 }
 0x1e3   :  { %v315_v41 = vadd.f32 %v464_v36, %v314_v40 }
 0x1e4   :  { %v548_v42 = vpop.f32.mrf.mxu1 }
 0x1e5   :  { %v319_v44 = vmax.f32 %v315_v41, 0.0 }
 0x1e7   :  { %v337_v45 = vpack.c.bf16 %v319_v44, %v318_v43 }
 0x1e9   :  { %566 = vmatmul.mubr.bf16.vlgmr.msra.gmra.mxu0 %v337_v45 }
 0x2a9   :  { %v426_v47 = vpop.f32.mrf.mxu0 }
 0x2aa   :  { %v427_v48 = vadd.f32 %v473_v46, %v426_v47 }
 0x2ab   :  { %v567_v49 = vpop.f32.mrf.mxu0 }
 0x2ac   :  { %433 = vst [vmem:[#allocation10] sm:$0xff] %v427_v48 }
 0x2ad   :  { %v429_v50 = vpop.f32.mrf.mxu0 }
 0x2ae   :  { %v430_v51 = vadd.f32 %v473_v46, %v429_v50 }
 0x2af   :  { %v568_v52 = vpop.f32.mrf.mxu0 }
 0x2b0   :  { %434 = vst [vmem:[#allocation10 + $0x8] sm:$0xff] %v430_v51 }
 0x2b1   :  { %696 = shalt.err (!%p693_p10)
}
 0x2b2   :  { %s722_s26 = smov 128   ;;  %s723_s6 = smov 8  }
 0x2b3   :  { %446 = dma.vmem_to_hbm [thread:$0]  %s441_s25, 256, %s837_s7, [#allocation4], %s722_s26, %s722_s26, %s723_s6  }
 0x2b4   :  { %711 = dma.done.wait [#allocation4], 256  }
 0x2b5   :  { %712 = vsyncadd [#allocation4], 4294967040 }
 0x2b6   :  { %450 = vsyncpa [#allocation3], 1 }
 0x2b7   :  { %451 = vsyncpa [#allocation6], 1 }
 0x2b8   :  { %452 = vsyncpa [#allocation9], 1 }
 0x2b9   :  { %453 = vsyncpa [#allocation4], 1 }

// kernel: tpu_custom_call.1
= control target key start
LH: loop header
LB: loop body
LE: loop exit
PB: predicated region body
PF: predicated region fallthrough
CT: control target
= control target key end

     0   :  { %12 = vsyncpa [#allocation3], 0  ;;  %s830_s0 = inlined_call_operand.hbm [shape: bf16[16,128], index: 0, kind: input, shape index: {}]   ;;  %s831_s1 = inlined_call_operand.hbm [shape: bf16[128,128], index: 1, kind: input, shape index: {}]   ;;  %s832_s2 = inlined_call_operand.vmem [shape: f32[1,128], index: 2, kind: input, shape index: {}]   ;;  %s833_s3 = inlined_call_operand.hbm [shape: bf16[128,128], index: 3, kind: input, shape index: {}]   ;;  %s834_s4 = inlined_call_operand.vmem [shape: f32[1,128], index: 4, kind: input, shape index: {}]   ;;  %s835_s5 = inlined_call_operand.hbm [shape: bf16[128,128], index: 5, kind: input, shape index: {}]   ;;  %s836_s6 = inlined_call_operand.vmem [shape: f32[1,128], index: 6, kind: input, shape index: {}]   ;;  %s837_s7 = inlined_call_operand.hbm [shape: f32[16,128], index: 7, kind: output, shape index: {}]  }
   0x1   :  { %13 = vsyncpa [#allocation6], 0 }
   0x2   :  { %14 = vsyncpa [#allocation9], 0 }
   0x3   :  { %15 = vsyncpa [#allocation4], 0  ;;  %s713_s24 = smov [#allocation5]   ;;  %s714_s26 = smov [#allocation2]  }
   0x4   :  { %s33_s25 = sshll.u32 %s713_s24, 4  ;;  %s21_s27 = sshll.u32 %s714_s26, 4  ;;  %s34_s25 = int_to_ptr.vmem [resolvable:$true] %s33_s25  ;;  %s22_s27 = int_to_ptr.vmem [resolvable:$true] %s21_s27 }
   0x5   :  { %s613_s28 = scalar_lea.vmem %s34_s25, 1024  ;;  %p618_p1 = scmp.lt.s32.totalorder %s34_s25, %s34_s25 }
   0x6   :  { %p614_p0 = scmp.ne.s32.totalorder %s34_s25, %s613_s28  ;;  %p619_p2 = scmp.lt.s32.totalorder %s613_s28, %s613_s28 }
   0x8   :  { %p620_p3 = por %p619_p2, %p618_p1 }
   0xa   :  { %p621_p4 = pnand %p620_p3, %p614_p0 }
   0xc   :  { %624 = shalt.err (!%p621_p4)
}
   0xd   :  { %s715_s29 = smov 64   ;;  %s716_s30 = smov 4  }
   0xe   :  { %39 = dma.hbm_to_vmem [thread:$0]  %s831_s1, 1024, %s34_s25, [#allocation6], %s715_s29, %s715_s29, %s716_s30  }
   0xf   :  { %s633_s10 = scalar_lea.vmem %s22_s27, 128  ;;  %p638_p6 = scmp.lt.s32.totalorder %s22_s27, %s22_s27 }
  0x10   :  { %p634_p5 = scmp.ne.s32.totalorder %s22_s27, %s633_s10  ;;  %p639_p7 = scmp.lt.s32.totalorder %s633_s10, %s633_s10 }
  0x12   :  { %p640_p8 = por %p639_p7, %p638_p6 }
  0x14   :  { %p641_p9 = pnand %p640_p8, %p634_p5 }
  0x16   :  { %644 = shalt.err (!%p641_p9)
}
  0x17   :  { %27 = dma.hbm_to_vmem [thread:$0]  %s830_s0, 128, %s22_s27, [#allocation3], %s715_s29, %s715_s29, %s716_s30  }
  0x18   :  { %s717_s13 = smov [#allocation7]   ;;  %s718_s15 = smov [#allocation8]  }
  0x19   :  { %s47_s14 = sshll.u32 %s717_s13, 4  ;;  %s61_s16 = sshll.u32 %s718_s15, 4  ;;  %s48_s14 = int_to_ptr.vmem [resolvable:$true] %s47_s14  ;;  %s62_s16 = int_to_ptr.vmem [resolvable:$true] %s61_s16 }
  0x1a   :  { %s653_s1 = scalar_lea.vmem %s48_s14, 1024  ;;  %p658_p11 = scmp.lt.s32.totalorder %s48_s14, %s48_s14 }
  0x1b   :  { %p654_p10 = scmp.ne.s32.totalorder %s48_s14, %s653_s1  ;;  %p659_p12 = scmp.lt.s32.totalorder %s653_s1, %s653_s1 }
  0x1d   :  { %p660_p13 = por %p659_p12, %p658_p11 }
  0x1f   :  { %p661_p0 = pnand %p660_p13, %p654_p10 }
  0x21   :  { %664 = shalt.err (!%p661_p0)
}
  0x22   :  { %53 = dma.hbm_to_vmem [thread:$0]  %s833_s3, 1024, %s48_s14, [#allocation6], %s715_s29, %s715_s29, %s716_s30  }
  0x23   :  { %s673_s0 = scalar_lea.vmem %s62_s16, 1024  ;;  %p678_p2 = scmp.lt.s32.totalorder %s62_s16, %s62_s16 }
  0x24   :  { %p674_p1 = scmp.ne.s32.totalorder %s62_s16, %s673_s0  ;;  %p679_p3 = scmp.lt.s32.totalorder %s673_s0, %s673_s0 }
  0x26   :  { %p680_p4 = por %p679_p3, %p678_p2 }
  0x28   :  { %p681_p5 = pnand %p680_p4, %p674_p1 }
  0x2a   :  { %684 = shalt.err (!%p681_p5)
}
  0x2b   :  { %67 = dma.hbm_to_vmem [thread:$0]  %s835_s5, 1024, %s62_s16, [#allocation9], %s715_s29, %s715_s29, %s716_s30  }
  0x2c   :  { %705 = dma.done.wait [#allocation3], 128  }
  0x2d   :  { %706 = vsyncadd [#allocation3], 4294967168 }
  0x2e   :  { %707 = dma.done.wait [#allocation6], 2048  }
  0x2f   :  { %708 = vsyncadd [#allocation6], 4294965248 }
  0x30   :  { %709 = dma.done.wait [#allocation9], 1024  }
  0x31   :  { %710 = vsyncadd [#allocation9], 4294966272  ;;  %v719_v0 = vmov 0.0   ;;  %vm720_vm0 = vmmov 0   ;;  %v580_v1 = vld [vmem:[#allocation5 + $0x38] sm:$0xff]   ;;  %v581_v2 = vld [vmem:[#allocation5 + $0x30] sm:$0xff]  }
  0x32   :  { %509 = vmatprep.subr.bf16.mxu0 %v719_v0  ;;  %525 = vmatprep.mubr.msk.bf16.mxu0 %vm720_vm0, %v719_v0  ;;  %v582_v3 = vld [vmem:[#allocation5 + $0x28] sm:$0xff]   ;;  %v589_v4 = vld [vmem:[#allocation7 + $0x38] sm:$0xff]   ;;  %v583_v5 = vld [vmem:[#allocation5 + $0x20] sm:$0xff]   ;;  %s721_s24 = smov [#allocation10]  }
  0x33   :  { %529 = vmatprep.subr.bf16.mxu1 %v719_v0  ;;  %545 = vmatprep.mubr.msk.bf16.mxu1 %vm720_vm0, %v719_v0  ;;  %v590_v6 = vld [vmem:[#allocation7 + $0x30] sm:$0xff]   ;;  %v584_v7 = vld [vmem:[#allocation5 + $0x18] sm:$0xff]   ;;  %v591_v8 = vld [vmem:[#allocation7 + $0x28] sm:$0xff]   ;;  %s440_s25 = sshll.u32 %s721_s24, 4  ;;  %s441_s25 = int_to_ptr.vmem [resolvable:$true] %s440_s25 }
  0x34   :  { %510 = vmatpush3.bf16.msra.mxu0 %v580_v1  ;;  %530 = vmatpush3.bf16.msra.mxu1 %v589_v4  ;;  %v585_v9 = vld [vmem:[#allocation5 + $0x10] sm:$0xff]   ;;  %v592_v10 = vld [vmem:[#allocation7 + $0x20] sm:$0xff]   ;;  %v586_v11 = vld [vmem:[#allocation5 + $0x8] sm:$0xff]   ;;  %p690_p7 = scmp.lt.s32.totalorder %s441_s25, %s441_s25 }
  0x35   :  { %511 = vmatprep.subr.bf16.mxu0 %v719_v0  ;;  %531 = vmatprep.subr.bf16.mxu1 %v719_v0  ;;  %v593_v12 = vld [vmem:[#allocation7 + $0x18] sm:$0xff]   ;;  %v587_v13 = vld [vmem:[#allocation5] sm:$0xff]   ;;  %v594_v15 = vld [vmem:[#allocation7 + $0x10] sm:$0xff]  }
  0x36   :  { %v588_v14 = vld [vmem:[#allocation2] sm:$0xff]   ;;  %v595_v16 = vld [vmem:[#allocation7 + $0x8] sm:$0xff]   ;;  %v596_v17 = vld [vmem:[#allocation7] sm:$0xff]  }
  0x37   :  { %v597_v18 = vld [vmem:[#allocation8 + $0x38] sm:$0xff]   ;;  %v598_v19 = vld [vmem:[#allocation8 + $0x30] sm:$0xff]   ;;  %v599_v20 = vld [vmem:[#allocation8 + $0x28] sm:$0xff]  }
  0x38   :  { %512 = vmatpush3.bf16.msra.mxu0 %v581_v2  ;;  %532 = vmatpush3.bf16.msra.mxu1 %v590_v6  ;;  %v600_v21 = vld [vmem:[#allocation8 + $0x20] sm:$0xff]   ;;  %v601_v22 = vld [vmem:[#allocation8 + $0x18] sm:$0xff]   ;;  %v602_v33 = vld [vmem:[#allocation8 + $0x10] sm:$0xff]  }
  0x39   :  { %513 = vmatprep.subr.bf16.mxu0 %v719_v0  ;;  %533 = vmatprep.subr.bf16.mxu1 %v719_v0  ;;  %v454_v23 = vld [vmem:[%s832_s2] ss:$0 sm:$0xff]  ;;  %v603_v34 = vld [vmem:[#allocation8 + $0x8] sm:$0xff]   ;;  %v604_v35 = vld [vmem:[#allocation8] sm:$0xff]  }
  0x3a   :  { %v464_v36 = vld [vmem:[%s834_s4] ss:$0 sm:$0xff]  ;;  %s685_s4 = scalar_lea.vmem %s441_s25, 256 }
  0x3b   :  { %v473_v46 = vld [vmem:[%s836_s6] ss:$0 sm:$0xff]  ;;  %p686_p6 = scmp.ne.s32.totalorder %s441_s25, %s685_s4  ;;  %p691_p8 = scmp.lt.s32.totalorder %s685_s4, %s685_s4 }
  0x3c   :  { %514 = vmatpush3.bf16.msra.mxu0 %v582_v3  ;;  %534 = vmatpush3.bf16.msra.mxu1 %v591_v8 }
  0x3d   :  { %515 = vmatprep.subr.bf16.mxu0 %v719_v0  ;;  %535 = vmatprep.subr.bf16.mxu1 %v719_v0  ;;  %p692_p9 = por %p691_p8, %p690_p7 }
  0x3f   :  { %p693_p10 = pnand %p692_p9, %p686_p6 }
  0x40   :  { %516 = vmatpush3.bf16.msra.mxu0 %v583_v5  ;;  %536 = vmatpush3.bf16.msra.mxu1 %v592_v10 }
  0x41   :  { %517 = vmatprep.subr.bf16.mxu0 %v719_v0  ;;  %537 = vmatprep.subr.bf16.mxu1 %v719_v0 }
  0x44   :  { %518 = vmatpush3.bf16.msra.mxu0 %v584_v7  ;;  %538 = vmatpush3.bf16.msra.mxu1 %v593_v12 }
  0x45   :  { %519 = vmatprep.subr.bf16.mxu0 %v719_v0  ;;  %539 = vmatprep.subr.bf16.mxu1 %v719_v0 }
  0x48   :  { %520 = vmatpush3.bf16.msra.mxu0 %v585_v9  ;;  %540 = vmatpush3.bf16.msra.mxu1 %v594_v15 }
  0x49   :  { %521 = vmatprep.subr.bf16.mxu0 %v719_v0  ;;  %541 = vmatprep.subr.bf16.mxu1 %v719_v0 }
  0x4c   :  { %522 = vmatpush3.bf16.msra.mxu0 %v586_v11  ;;  %542 = vmatpush3.bf16.msra.mxu1 %v595_v16 }
  0x4d   :  { %523 = vmatprep.subr.bf16.mxu0 %v719_v0  ;;  %543 = vmatprep.subr.bf16.mxu1 %v719_v0 }
  0x50   :  { %524 = vmatpush3.bf16.msra.mxu0 %v587_v13  ;;  %544 = vmatpush3.bf16.msra.mxu1 %v596_v17 }
  0x51   :  { %549 = vmatprep.subr.bf16.mxu0 %v719_v0 }
  0x53   :  { %526 = vmatmul.mubr.bf16.vlgmr.msra.gmra.mxu0 %v588_v14 }
  0x54   :  { %565 = vmatprep.mubr.msk.bf16.mxu0 %vm720_vm0, %v719_v0  ;;  %550 = vmatpush3.bf16.msra.mxu0 %v597_v18 }
  0x55   :  { %551 = vmatprep.subr.bf16.mxu0 %v719_v0 }
  0x58   :  { %552 = vmatpush3.bf16.msra.mxu0 %v598_v19 }
  0x59   :  { %553 = vmatprep.subr.bf16.mxu0 %v719_v0 }
  0x5c   :  { %554 = vmatpush3.bf16.msra.mxu0 %v599_v20 }
  0x5d   :  { %555 = vmatprep.subr.bf16.mxu0 %v719_v0 }
  0x60   :  { %556 = vmatpush3.bf16.msra.mxu0 %v600_v21 }
  0x61   :  { %557 = vmatprep.subr.bf16.mxu0 %v719_v0 }
  0x64   :  { %558 = vmatpush3.bf16.msra.mxu0 %v601_v22 }
  0x65   :  { %559 = vmatprep.subr.bf16.mxu0 %v719_v0 }
  0x68   :  { %560 = vmatpush3.bf16.msra.mxu0 %v602_v33 }
  0x69   :  { %561 = vmatprep.subr.bf16.mxu0 %v719_v0 }
  0x6c   :  { %562 = vmatpush3.bf16.msra.mxu0 %v603_v34 }
  0x6d   :  { %563 = vmatprep.subr.bf16.mxu0 %v719_v0 }
  0x70   :  { %564 = vmatpush3.bf16.msra.mxu0 %v604_v35 }
 0x113   :  { %v196_v24 = vpop.f32.mrf.mxu0 }
 0x114   :  { %v197_v26 = vadd.f32 %v454_v23, %v196_v24 }
 0x115   :  { %v527_v25 = vpop.f32.mrf.mxu0 }
 0x116   :  { %v203_v30 = vmax.f32 %v197_v26, 0.0 }
 0x117   :  { %v199_v27 = vpop.f32.mrf.mxu0 }
 0x118   :  { %v200_v28 = vadd.f32 %v454_v23, %v199_v27 }
 0x119   :  { %v528_v29 = vpop.f32.mrf.mxu0 }
 0x11a   :  { %v204_v31 = vmax.f32 %v200_v28, 0.0 }
 0x11c   :  { %v222_v32 = vpack.c.bf16 %v204_v31, %v203_v30 }
 0x11e   :  { %546 = vmatmul.mubr.bf16.vlgmr.msra.gmra.mxu1 %v222_v32 }
 0x1de   :  { %v311_v37 = vpop.f32.mrf.mxu1 }
 0x1df   :  { %v312_v39 = vadd.f32 %v464_v36, %v311_v37 }
 0x1e0   :  { %v547_v38 = vpop.f32.mrf.mxu1 }
 0x1e1   :  { %v318_v43 = vmax.f32 %v312_v39, 0.0 }
 0x1e2   :  { %v314_v40 = vpop.f32.mrf.mxu1 }
 0x1e3   :  { %v315_v41 = vadd.f32 %v464_v36, %v314_v40 }
 0x1e4   :  { %v548_v42 = vpop.f32.mrf.mxu1 }
 0x1e5   :  { %v319_v44 = vmax.f32 %v315_v41, 0.0 }
 0x1e7   :  { %v337_v45 = vpack.c.bf16 %v319_v44, %v318_v43 }
 0x1e9   :  { %566 = vmatmul.mubr.bf16.vlgmr.msra.gmra.mxu0 %v337_v45 }
 0x2a9   :  { %v426_v47 = vpop.f32.mrf.mxu0 }
 0x2aa   :  { %v427_v48 = vadd.f32 %v473_v46, %v426_v47 }
 0x2ab   :  { %v567_v49 = vpop.f32.mrf.mxu0 }
 0x2ac   :  { %433 = vst [vmem:[#allocation10] sm:$0xff] %v427_v48 }
 0x2ad   :  { %v429_v50 = vpop.f32.mrf.mxu0 }
 0x2ae   :  { %v430_v51 = vadd.f32 %v473_v46, %v429_v50 }
 0x2af   :  { %v568_v52 = vpop.f32.mrf.mxu0 }
 0x2b0   :  { %434 = vst [vmem:[#allocation10 + $0x8] sm:$0xff] %v430_v51 }
 0x2b1   :  { %696 = shalt.err (!%p693_p10)
}
 0x2b2   :  { %s722_s26 = smov 128   ;;  %s723_s6 = smov 8  }
 0x2b3   :  { %446 = dma.vmem_to_hbm [thread:$0]  %s441_s25, 256, %s837_s7, [#allocation4], %s722_s26, %s722_s26, %s723_s6  }
 0x2b4   :  { %711 = dma.done.wait [#allocation4], 256  }
 0x2b5   :  { %712 = vsyncadd [#allocation4], 4294967040 }
 0x2b6   :  { %450 = vsyncpa [#allocation3], 1 }
 0x2b7   :  { %451 = vsyncpa [#allocation6], 1 }
 0x2b8   :  { %452 = vsyncpa [#allocation9], 1 }
 0x2b9   :  { %453 = vsyncpa [#allocation4], 1 }

</bundles_post_ra>
